<compile_context>
chip_gen: v6e
topology: v6e:2x2x1
jax: 0.10.0
libtpu: 0.0.40
codegen_flags: <defaults>
</compile_context>

<pallas_src>
import functools

import jax
import jax.numpy as jnp
from jax.experimental import pallas as pl
from jax.experimental.pallas import tpu as pltpu


def _cross_attention_kernel(x_ref, key_ref, val_ref,
                            wq_ref, wk_ref, wv_ref, wo_ref, bo_ref,
                            o_ref, acc_ref, *, scale):
    h = pl.program_id(2)
    num_heads = pl.num_programs(2)

    @pl.when(h == 0)
    def _():
        acc_ref[...] = jnp.zeros_like(acc_ref)

    # Per-head projections: bf16 inputs, f32 MXU accumulation.
    q = jnp.dot(x_ref[...], wq_ref[...], preferred_element_type=jnp.float32)    # (tq, C)
    k = jnp.dot(key_ref[...], wk_ref[...], preferred_element_type=jnp.float32)  # (M, C)
    v = jnp.dot(val_ref[...], wv_ref[...], preferred_element_type=jnp.float32)  # (M, C)

    # Scores: contract the head dim of K directly (no explicit transpose).
    sim = jax.lax.dot_general(
        q.astype(jnp.bfloat16), k.astype(jnp.bfloat16),
        dimension_numbers=(((1,), (1,)), ((), ())),
        preferred_element_type=jnp.float32) * scale                             # (tq, M)

    # TODO(synk): optional `mask` / perl_box_masking_map / perl_road_masking_map
    # additive terms (all None in the default forward) are not wired in.
    # TODO(synk): for large self-attention M, stream K/V in M-tiles with online
    # softmax (flash-style) instead of materializing the full (tq, M) scores.

    # Softmax in f32 (VPU); reciprocal on the EUP slot.
    sim = sim - jnp.max(sim, axis=-1, keepdims=True)
    p = jnp.exp(sim)
    attn = p * pl.reciprocal(jnp.sum(p, axis=-1, keepdims=True), approx=True)

    # Attention-weighted values, then this head's slice of the output projection,
    # accumulated across the head grid axis.
    oh = jnp.dot(attn.astype(jnp.bfloat16), v.astype(jnp.bfloat16),
                 preferred_element_type=jnp.float32)                            # (tq, C)
    acc_ref[...] += jnp.dot(oh.astype(jnp.bfloat16), wo_ref[...],
                            preferred_element_type=jnp.float32)                 # (tq, Dq)

    @pl.when(h == num_heads - 1)
    def _():
        # Output projection bias; Dropout(p=0) is the identity.
        o_ref[...] = (acc_ref[...] + bo_ref[...]).astype(o_ref.dtype)


def _pick_q_tile(n, max_tile=256):
    """Largest tile <= max_tile (multiple of 8) that divides n; else whole n."""
    if n <= max_tile:
        return n
    t = max_tile
    while t >= 8:
        if n % t == 0:
            return t
        t -= 8
    return n


def cross_attention(x, key, value, wq, wk, wv, wo, bo, *, heads, dim_head):
    B, N, Dq = x.shape
    _, M, Dk = key.shape
    _, _, Dv = value.shape
    inner = heads * dim_head
    assert wq.shape == (Dq, inner) and wk.shape == (Dk, inner) and wv.shape == (Dv, inner)
    assert wo.shape == (inner, Dq)
    scale = dim_head ** (-0.5)

    tq = _pick_q_tile(N)
    num_q_tiles = N // tq

    # One-time weight prep in plain XLA: per-head layouts and bf16 at rest.
    cdt = jnp.bfloat16
    wq_h = wq.reshape(Dq, heads, dim_head).transpose(1, 0, 2).astype(cdt)   # (H, Dq, C)
    wk_h = wk.reshape(Dk, heads, dim_head).transpose(1, 0, 2).astype(cdt)   # (H, Dk, C)
    wv_h = wv.reshape(Dv, heads, dim_head).transpose(1, 0, 2).astype(cdt)   # (H, Dv, C)
    wo_h = wo.reshape(heads, dim_head, Dq).astype(cdt)                       # (H, C, Dq)
    bo2 = bo.reshape(1, Dq).astype(jnp.float32)

    xb = x.astype(cdt)
    keyb = key.astype(cdt)
    valb = value.astype(cdt)

    kernel = functools.partial(_cross_attention_kernel, scale=scale)

    grid = (B, num_q_tiles, heads)
    return pl.pallas_call(
        kernel,
        grid=grid,
        in_specs=[
            pl.BlockSpec((pl.Squeezed(), tq, Dq), lambda b, i, h: (b, i, 0)),
            pl.BlockSpec((pl.Squeezed(), M, Dk), lambda b, i, h: (b, 0, 0)),
            pl.BlockSpec((pl.Squeezed(), M, Dv), lambda b, i, h: (b, 0, 0)),
            pl.BlockSpec((pl.Squeezed(), Dq, dim_head), lambda b, i, h: (h, 0, 0)),
            pl.BlockSpec((pl.Squeezed(), Dk, dim_head), lambda b, i, h: (h, 0, 0)),
            pl.BlockSpec((pl.Squeezed(), Dv, dim_head), lambda b, i, h: (h, 0, 0)),
            pl.BlockSpec((pl.Squeezed(), dim_head, Dq), lambda b, i, h: (h, 0, 0)),
            pl.BlockSpec((1, Dq), lambda b, i, h: (0, 0)),
        ],
        out_specs=pl.BlockSpec((pl.Squeezed(), tq, Dq), lambda b, i, h: (b, i, 0)),
        out_shape=jax.ShapeDtypeStruct((B, N, Dq), jnp.float32),
        scratch_shapes=[pltpu.VMEM((tq, Dq), jnp.float32)],
        compiler_params=pltpu.CompilerParams(
            dimension_semantics=("parallel", "parallel", "arbitrary"),
            # Conservative cap so the same tiling fits v7x's 64 MiB VMEM as well
            # as v5e/v6e's 128 MiB.
            vmem_limit_bytes=48 * 1024 * 1024),
    )(xb, keyb, valb, wq_h, wk_h, wv_h, wo_h, bo2)


def reference(x, key, value, wq, wk, wv, wo, bo, *, heads, dim_head):
    B, N, _ = x.shape
    _, M, _ = key.shape
    scale = dim_head ** (-0.5)
    q = x @ wq
    k = key @ wk
    v = value @ wv
    q = q.reshape(B, N, heads, dim_head).transpose(0, 2, 1, 3).reshape(B * heads, N, dim_head)
    k = k.reshape(B, M, heads, dim_head).transpose(0, 2, 1, 3).reshape(B * heads, M, dim_head)
    v = v.reshape(B, M, heads, dim_head).transpose(0, 2, 1, 3).reshape(B * heads, M, dim_head)
    sim = jnp.einsum('bid,bjd->bij', q, k) * scale
    attn = jax.nn.softmax(sim, axis=-1)
    out = jnp.einsum('bij,bjd->bid', attn, v)
    out = out.reshape(B, heads, N, dim_head).transpose(0, 2, 1, 3).reshape(B, N, heads * dim_head)
    return out @ wo + bo


if __name__ == "__main__":
    # Small, module-consistent shapes.
    B, N, M = 2, 16, 8
    query_dim, key_dim, value_dim = 32, 32, 32
    heads, dim_head = 4, 16
    inner = heads * dim_head

    rng = jax.random.PRNGKey(0)
    ks = jax.random.split(rng, 8)

    def init(k, shape, fan_in):
        bound = 1.0 / (fan_in ** 0.5)
        return jax.random.uniform(k, shape, jnp.float32, -bound, bound)

    x = jax.random.normal(ks[0], (B, N, query_dim), jnp.float32)
    key = jax.random.normal(ks[1], (B, M, key_dim), jnp.float32)
    value = jax.random.normal(ks[2], (B, M, value_dim), jnp.float32)

    wq = init(ks[3], (query_dim, inner), query_dim)   # to_q (no bias)
    wk = init(ks[4], (key_dim, inner), key_dim)       # to_k (no bias)
    wv = init(ks[5], (value_dim, inner), value_dim)   # to_v (no bias)
    wo = init(ks[6], (inner, query_dim), inner)       # to_out[0] weight
    bo = init(ks[7], (1, query_dim), inner)           # to_out[0] bias

    out = cross_attention(x, key, value, wq, wk, wv, wo, bo,
                          heads=heads, dim_head=dim_head)
    out = jax.block_until_ready(out)

    ref = reference(x, key, value, wq, wk, wv, wo, bo,
                    heads=heads, dim_head=dim_head)
    assert out.shape == (B, N, query_dim)
    # bf16 MXU inputs (f32 accumulation) -> compare against the f32 reference
    # with a bf16-appropriate tolerance.
    assert jnp.allclose(out, ref, atol=2e-2, rtol=2e-2)

    print("KERNEL_OK")
</pallas_src>

<mosaic_0001>
module attributes {stable_mosaic.version = 11 : i64} {
  func.func @_cross_attention_kernel(%arg0: i32, %arg1: i32, %arg2: i32, %arg3: memref<1x16x32xbf16, #tpu.memory_space<vmem>>, %arg4: memref<1x8x32xbf16, #tpu.memory_space<vmem>>, %arg5: memref<1x8x32xbf16, #tpu.memory_space<vmem>>, %arg6: memref<1x32x16xbf16, #tpu.memory_space<vmem>>, %arg7: memref<1x32x16xbf16, #tpu.memory_space<vmem>>, %arg8: memref<1x32x16xbf16, #tpu.memory_space<vmem>>, %arg9: memref<1x16x32xbf16, #tpu.memory_space<vmem>>, %arg10: memref<1x32xf32, #tpu.memory_space<vmem>>, %arg11: memref<1x16x32xf32, #tpu.memory_space<vmem>>, %arg12: memref<16x32xf32, #tpu.memory_space<vmem>>) attributes {dimension_semantics = [#tpu.dimension_semantics<parallel>, #tpu.dimension_semantics<parallel>, #tpu.dimension_semantics<arbitrary>], iteration_bounds = array<i64: 2, 1, 4>, scalar_prefetch = 0 : i64, scratch_operands = 1 : i64, tpu.core_type = #tpu.core_type<tc>, window_params = [{transform_indices = @transform_0, window_bounds = array<i64: 1, 16, 32>}, {transform_indices = @transform_1, window_bounds = array<i64: 1, 8, 32>}, {transform_indices = @transform_2, window_bounds = array<i64: 1, 8, 32>}, {transform_indices = @transform_3, window_bounds = array<i64: 1, 32, 16>}, {transform_indices = @transform_4, window_bounds = array<i64: 1, 32, 16>}, {transform_indices = @transform_5, window_bounds = array<i64: 1, 32, 16>}, {transform_indices = @transform_6, window_bounds = array<i64: 1, 16, 32>}, {pipeline_mode = #tpu.pipeline_mode<synchronous>, transform_indices = @transform_7, window_bounds = array<i64: 1, 32>}, {transform_indices = @transform_8, window_bounds = array<i64: 1, 16, 32>}]} {
    %c0_i32 = arith.constant 0 : i32
    %0 = arith.cmpi eq, %arg2, %c0_i32 : i32
    %1 = arith.extui %0 : i1 to i32
    %c0_i32_0 = arith.constant 0 : i32
    %2 = arith.cmpi ne, %1, %c0_i32_0 : i32
    scf.if %2 {
      %cst_34 = arith.constant 0.000000e+00 : f32
      %46 = vector.broadcast %cst_34 : f32 to vector<16x32xf32>
      %c0_35 = arith.constant 0 : index
      %c0_36 = arith.constant 0 : index
      %47 = vector.load %arg12[%c0_35, %c0_36] : memref<16x32xf32, #tpu.memory_space<vmem>>, vector<16x32xf32>
      tpu.vector_store %arg12[%c0_35, %c0_36], %46 {strides = array<i32>} : memref<16x32xf32, #tpu.memory_space<vmem>>, vector<16x32xf32>,
    } else {
    }
    %c0 = arith.constant 0 : index
    %c0_1 = arith.constant 0 : index
    %c0_2 = arith.constant 0 : index
    %3 = vector.load %arg3[%c0, %c0_1, %c0_2] : memref<1x16x32xbf16, #tpu.memory_space<vmem>>, vector<1x16x32xbf16>
    %4 = vector.shape_cast %3 : vector<1x16x32xbf16> to vector<16x32xbf16>
    %c0_3 = arith.constant 0 : index
    %c0_4 = arith.constant 0 : index
    %c0_5 = arith.constant 0 : index
    %5 = vector.load %arg6[%c0_3, %c0_4, %c0_5] : memref<1x32x16xbf16, #tpu.memory_space<vmem>>, vector<1x32x16xbf16>
    %6 = vector.shape_cast %5 : vector<1x32x16xbf16> to vector<32x16xbf16>
    %cst = arith.constant dense<0.000000e+00> : vector<16x16xf32>
    %7 = tpu.matmul %4, %6, %cst {dimension_numbers = #tpu.dot_dimension_numbers<[1], [0], [0], [1], [0, 0, 1, 1], [], []>} : vector<16x32xbf16>, vector<32x16xbf16>, vector<16x16xf32> -> vector<16x16xf32>
    %c0_6 = arith.constant 0 : index
    %c0_7 = arith.constant 0 : index
    %c0_8 = arith.constant 0 : index
    %8 = vector.load %arg4[%c0_6, %c0_7, %c0_8] : memref<1x8x32xbf16, #tpu.memory_space<vmem>>, vector<1x8x32xbf16>
    %9 = vector.shape_cast %8 : vector<1x8x32xbf16> to vector<8x32xbf16>
    %c0_9 = arith.constant 0 : index
    %c0_10 = arith.constant 0 : index
    %c0_11 = arith.constant 0 : index
    %10 = vector.load %arg7[%c0_9, %c0_10, %c0_11] : memref<1x32x16xbf16, #tpu.memory_space<vmem>>, vector<1x32x16xbf16>
    %11 = vector.shape_cast %10 : vector<1x32x16xbf16> to vector<32x16xbf16>
    %cst_12 = arith.constant dense<0.000000e+00> : vector<8x16xf32>
    %12 = tpu.matmul %9, %11, %cst_12 {dimension_numbers = #tpu.dot_dimension_numbers<[1], [0], [0], [1], [0, 0, 1, 1], [], []>} : vector<8x32xbf16>, vector<32x16xbf16>, vector<8x16xf32> -> vector<8x16xf32>
    %c0_13 = arith.constant 0 : index
    %c0_14 = arith.constant 0 : index
    %c0_15 = arith.constant 0 : index
    %13 = vector.load %arg5[%c0_13, %c0_14, %c0_15] : memref<1x8x32xbf16, #tpu.memory_space<vmem>>, vector<1x8x32xbf16>
    %14 = vector.shape_cast %13 : vector<1x8x32xbf16> to vector<8x32xbf16>
    %c0_16 = arith.constant 0 : index
    %c0_17 = arith.constant 0 : index
    %c0_18 = arith.constant 0 : index
    %15 = vector.load %arg8[%c0_16, %c0_17, %c0_18] : memref<1x32x16xbf16, #tpu.memory_space<vmem>>, vector<1x32x16xbf16>
    %16 = vector.shape_cast %15 : vector<1x32x16xbf16> to vector<32x16xbf16>
    %cst_19 = arith.constant dense<0.000000e+00> : vector<8x16xf32>
    %17 = tpu.matmul %14, %16, %cst_19 {dimension_numbers = #tpu.dot_dimension_numbers<[1], [0], [0], [1], [0, 0, 1, 1], [], []>} : vector<8x32xbf16>, vector<32x16xbf16>, vector<8x16xf32> -> vector<8x16xf32>
    %18 = arith.truncf %7 : vector<16x16xf32> to vector<16x16xbf16>
    %19 = arith.truncf %12 : vector<8x16xf32> to vector<8x16xbf16>
    %cst_20 = arith.constant dense<0.000000e+00> : vector<16x8xf32>
    %20 = tpu.matmul %18, %19, %cst_20 {dimension_numbers = #tpu.dot_dimension_numbers<[1], [1], [0], [0], [0, 0, 1, 0], [], []>} : vector<16x16xbf16>, vector<8x16xbf16>, vector<16x8xf32> -> vector<16x8xf32>
    %cst_21 = arith.constant 2.500000e-01 : f32
    %21 = vector.broadcast %cst_21 : f32 to vector<16x8xf32>
    %22 = arith.mulf %20, %21 : vector<16x8xf32>
    %cst_22 = arith.constant dense<0xFF800000> : vector<16xf32>
    %23 = vector.multi_reduction <maximumf>, %22, %cst_22 [1] : vector<16x8xf32> to vector<16xf32>
    %24 = vector.shape_cast %23 : vector<16xf32> to vector<16x1xf32>
    %25 = vector.broadcast %24 : vector<16x1xf32> to vector<16x8xf32>
    %26 = arith.subf %22, %25 : vector<16x8xf32>
    %27 = math.exp %26 : vector<16x8xf32>
    %cst_23 = arith.constant dense<0.000000e+00> : vector<16xf32>
    %28 = vector.multi_reduction <add>, %27, %cst_23 [1] : vector<16x8xf32> to vector<16xf32>
    %29 = vector.shape_cast %28 : vector<16xf32> to vector<16x1xf32>
    %30 = tpu.reciprocal %29 {approx = true} : vector<16x1xf32> -> vector<16x1xf32>
    %31 = vector.broadcast %30 : vector<16x1xf32> to vector<16x8xf32>
    %32 = arith.mulf %27, %31 : vector<16x8xf32>
    %33 = arith.truncf %32 : vector<16x8xf32> to vector<16x8xbf16>
    %34 = arith.truncf %17 : vector<8x16xf32> to vector<8x16xbf16>
    %cst_24 = arith.constant dense<0.000000e+00> : vector<16x16xf32>
    %35 = tpu.matmul %33, %34, %cst_24 {dimension_numbers = #tpu.dot_dimension_numbers<[1], [0], [0], [1], [0, 0, 1, 1], [], []>} : vector<16x8xbf16>, vector<8x16xbf16>, vector<16x16xf32> -> vector<16x16xf32>
    %c0_25 = arith.constant 0 : index
    %c0_26 = arith.constant 0 : index
    %36 = vector.load %arg12[%c0_25, %c0_26] : memref<16x32xf32, #tpu.memory_space<vmem>>, vector<16x32xf32>
    %37 = arith.truncf %35 : vector<16x16xf32> to vector<16x16xbf16>
    %c0_27 = arith.constant 0 : index
    %c0_28 = arith.constant 0 : index
    %c0_29 = arith.constant 0 : index
    %38 = vector.load %arg9[%c0_27, %c0_28, %c0_29] : memref<1x16x32xbf16, #tpu.memory_space<vmem>>, vector<1x16x32xbf16>
    %39 = vector.shape_cast %38 : vector<1x16x32xbf16> to vector<16x32xbf16>
    %cst_30 = arith.constant dense<0.000000e+00> : vector<16x32xf32>
    %40 = tpu.matmul %37, %39, %cst_30 {dimension_numbers = #tpu.dot_dimension_numbers<[1], [0], [0], [1], [0, 0, 1, 1], [], []>} : vector<16x16xbf16>, vector<16x32xbf16>, vector<16x32xf32> -> vector<16x32xf32>
    %41 = arith.addf %36, %40 : vector<16x32xf32>
    %c0_31 = arith.constant 0 : index
    %c0_32 = arith.constant 0 : index
    %42 = vector.load %arg12[%c0_31, %c0_32] : memref<16x32xf32, #tpu.memory_space<vmem>>, vector<16x32xf32>
    tpu.vector_store %arg12[%c0_31, %c0_32], %41 {strides = array<i32>} : memref<16x32xf32, #tpu.memory_space<vmem>>, vector<16x32xf32>,
    %c3_i32 = arith.constant 3 : i32
    %43 = arith.cmpi eq, %arg2, %c3_i32 : i32
    %44 = arith.extui %43 : i1 to i32
    %c0_i32_33 = arith.constant 0 : i32
    %45 = arith.cmpi ne, %44, %c0_i32_33 : i32
    scf.if %45 {
      %c0_34 = arith.constant 0 : index
      %c0_35 = arith.constant 0 : index
      %46 = vector.load %arg12[%c0_34, %c0_35] : memref<16x32xf32, #tpu.memory_space<vmem>>, vector<16x32xf32>
      %c0_36 = arith.constant 0 : index
      %c0_37 = arith.constant 0 : index
      %47 = vector.load %arg10[%c0_36, %c0_37] : memref<1x32xf32, #tpu.memory_space<vmem>>, vector<1x32xf32>
      %48 = vector.broadcast %47 : vector<1x32xf32> to vector<16x32xf32>
      %49 = arith.addf %46, %48 : vector<16x32xf32>
      %c0_38 = arith.constant 0 : index
      %c0_39 = arith.constant 0 : index
      %c0_40 = arith.constant 0 : index
      %50 = vector.load %arg11[%c0_38, %c0_39, %c0_40] : memref<1x16x32xf32, #tpu.memory_space<vmem>>, vector<1x16x32xf32>
      %51 = vector.shape_cast %50 : vector<1x16x32xf32> to vector<16x32xf32>
      %52 = vector.shape_cast %49 : vector<16x32xf32> to vector<1x16x32xf32>
      tpu.vector_store %arg11[%c0_38, %c0_39, %c0_40], %52 {strides = array<i32>} : memref<1x16x32xf32, #tpu.memory_space<vmem>>, vector<1x16x32xf32>,
    } else {
    }
    return
  }
  func.func @transform_0(%arg0: i32, %arg1: i32, %arg2: i32) -> (i32, i32, i32) {
    %c0_i32 = arith.constant 0 : i32
    %c0_i32_0 = arith.constant 0 : i32
    return %arg0, %arg1, %c0_i32 : i32, i32, i32
  }
  func.func @transform_1(%arg0: i32, %arg1: i32, %arg2: i32) -> (i32, i32, i32) {
    %c0_i32 = arith.constant 0 : i32
    %c0_i32_0 = arith.constant 0 : i32
    %c0_i32_1 = arith.constant 0 : i32
    return %arg0, %c0_i32, %c0_i32_0 : i32, i32, i32
  }
  func.func @transform_2(%arg0: i32, %arg1: i32, %arg2: i32) -> (i32, i32, i32) {
    %c0_i32 = arith.constant 0 : i32
    %c0_i32_0 = arith.constant 0 : i32
    %c0_i32_1 = arith.constant 0 : i32
    return %arg0, %c0_i32, %c0_i32_0 : i32, i32, i32
  }
  func.func @transform_3(%arg0: i32, %arg1: i32, %arg2: i32) -> (i32, i32, i32) {
    %c0_i32 = arith.constant 0 : i32
    %c0_i32_0 = arith.constant 0 : i32
    %c0_i32_1 = arith.constant 0 : i32
    return %arg2, %c0_i32, %c0_i32_0 : i32, i32, i32
  }
  func.func @transform_4(%arg0: i32, %arg1: i32, %arg2: i32) -> (i32, i32, i32) {
    %c0_i32 = arith.constant 0 : i32
    %c0_i32_0 = arith.constant 0 : i32
    %c0_i32_1 = arith.constant 0 : i32
    return %arg2, %c0_i32, %c0_i32_0 : i32, i32, i32
  }
  func.func @transform_5(%arg0: i32, %arg1: i32, %arg2: i32) -> (i32, i32, i32) {
    %c0_i32 = arith.constant 0 : i32
    %c0_i32_0 = arith.constant 0 : i32
    %c0_i32_1 = arith.constant 0 : i32
    return %arg2, %c0_i32, %c0_i32_0 : i32, i32, i32
  }
  func.func @transform_6(%arg0: i32, %arg1: i32, %arg2: i32) -> (i32, i32, i32) {
    %c0_i32 = arith.constant 0 : i32
    %c0_i32_0 = arith.constant 0 : i32
    %c0_i32_1 = arith.constant 0 : i32
    return %arg2, %c0_i32, %c0_i32_0 : i32, i32, i32
  }
  func.func @transform_7(%arg0: i32, %arg1: i32, %arg2: i32) -> (i32, i32) {
    %c0_i32 = arith.constant 0 : i32
    %c0_i32_0 = arith.constant 0 : i32
    %c0_i32_1 = arith.constant 0 : i32
    return %c0_i32, %c0_i32_0 : i32, i32
  }
  func.func @transform_8(%arg0: i32, %arg1: i32, %arg2: i32) -> (i32, i32, i32) {
    %c0_i32 = arith.constant 0 : i32
    %c0_i32_0 = arith.constant 0 : i32
    return %arg0, %arg1, %c0_i32 : i32, i32, i32
  }
}

</mosaic_0001>

<bundles_post_ra>
// kernel: tpu_custom_call.1
= control target key start
LH: loop header
LB: loop body
LE: loop exit
PB: predicated region body
PF: predicated region fallthrough
CT: control target
= control target key end

     0   :  { %s1571_s0 = inlined_call_operand.vmem [shape: bf16[2,16,32], index: 0, kind: input, shape index: {}]   ;;  %s1572_s1 = inlined_call_operand.vmem [shape: bf16[2,8,32], index: 1, kind: input, shape index: {}]   ;;  %s1573_s2 = inlined_call_operand.vmem [shape: bf16[2,8,32], index: 2, kind: input, shape index: {}]   ;;  %s1574_s3 = inlined_call_operand.vmem [shape: bf16[4,32,16], index: 3, kind: input, shape index: {}]   ;;  %s1575_s4 = inlined_call_operand.vmem [shape: bf16[4,32,16], index: 4, kind: input, shape index: {}]   ;;  %s1576_s5 = inlined_call_operand.vmem [shape: bf16[4,32,16], index: 5, kind: input, shape index: {}]   ;;  %s1577_s6 = inlined_call_operand.vmem [shape: bf16[4,16,32], index: 6, kind: input, shape index: {}]   ;;  %s1578_s7 = inlined_call_operand.vmem [shape: f32[1,32], index: 7, kind: input, shape index: {}]   ;;  %s1579_s8 = inlined_call_operand.hbm [shape: f32[2,16,32], index: 8, kind: output, shape index: {}]  }
   0x1   :  { %1590 = sst [smem:[#allocation15_spill]] %s1571_s0 }
   0x2   :  { %1591 = sst [smem:[#allocation16_spill]] %s1572_s1 }
   0x3   :  { %1592 = sst [smem:[#allocation17_spill]] %s1579_s8 }
   0x4   :  { %13 = vsyncpa [#allocation4], 0 }
   0x5   :  { %15 = vsyncpa [#allocation4 + $0x1], 0  ;;  %s1366_s27 = smov 0   ;;  %s1368_s28 = smov 0  }
   0x6   :  { %s1370_s29 = smov 0   ;;  %s1372_s30 = smov 0  }
   0x7   :  { %s1374_s9 = smov 0   ;;  %s1376_s10 = smov 0  }
   0x8   :  { %s1378_s11 = smov 0   ;;  %s1380_s12 = smov 0  }
   0x9 LB: > { %1593 = sst [smem:[#allocation6_spill]] %s1285_s27  ;;  %s1026_s13 = sadd.s32 4294967295, %s1313_s12   ;;  %s1313_s12 = sphi %s1380_s12, %s21_s12   ;;  %s1309_s11 = sphi %s1378_s11, %s1617_s11   ;;  %s1305_s10 = sphi %s1376_s10, %s1616_s10   ;;  %s1301_s9 = sphi %s1374_s9, %s1615_s9   ;;  %s1297_s30 = sphi %s1372_s30, %s1620_s30   ;;  %s1293_s29 = sphi %s1370_s29, %s1613_s29   ;;  %s1289_s28 = sphi %s1368_s28, %s1619_s28   ;;  %s1285_s27 = sphi %s1366_s27, %s1618_s27  }
   0xa   : > { %1594 = sst [smem:[#allocation7_spill]] %s1293_s29  ;;  %s1027_s14 = sadd.s32 4294967294, %s1313_s12  }
   0xb   : > { %1595 = sst [smem:[#allocation8_spill]] %s1305_s10  ;;  %s33_s15 = sadd.s32 1, %s1305_s10 }
   0xc   : > { %1596 = sst [smem:[#allocation9_spill]] %s1309_s11  ;;  %p34_p0 = scmp.ge.s32.totalorder %s33_s15, 4 }
   0xd   : > { %1597 = sst [smem:[#allocation10_spill]] %s1313_s12  ;;  %s40_s16 = sadd.s32 1, %s1309_s11 }
   0xe   : > { %p264_p1 = scmp.ne.s32.totalorder %s1293_s29, %s1289_s28  ;;  %p265_p2 = scmp.eq.s32.totalorder %s1026_s13, 7 }
   0xf   : > { %s1622_s15 = smov (%p34_p0, %s33_s15), 0  ;;  %s1624_s16 = smov (!%p34_p0, %s40_s16), %s1309_s11 }
  0x10   : > { %1598 = sst [smem:[#allocation11_spill]] %s1622_s15  ;;  %p1415_p3 = por %p265_p2, %p264_p1 }
  0x11   : > { %p270_p4 = scmp.ne.s32.totalorder %s1289_s28, %s1285_s27  ;;  %p42_p5 = scmp.ge.s32.totalorder %s1624_s16, 2 }
  0x12   : > { %p271_p6 = scmp.eq.s32.totalorder %s1027_s14, 7  ;;  %p1030_p7 = scmp.ge.s32.totalorder %s1313_s12, 1 }
  0x13   : > { %p351_p8 = scmp.lt.s32.totalorder %s1313_s12, 9  ;;  %s1626_s16 = smov (%p42_p5, %s1624_s16), 0 }
  0x14   : > { %1600 = sst [smem:[#allocation12_spill]] %s1626_s16  ;;  %p1425_p9 = por %p271_p6, %p270_p4 }
  0x15   : > { %p352_p10 = pnand %p1030_p7, %p351_p8  ;;  %s249_s19 = ssub.s32 %s1309_s11, %s1626_s16 }
  0x16   : > { %s1601_s18 = scalar_select %p1425_p9, 1, 0 }
  0x17   : > { %s254_s20 = sadd.s32 1, %s1293_s29  ;;  %p252_p11 = scmp.eq.s32.totalorder %s249_s19, 0 }
  0x18   : > { %1602 = sst [smem:[#allocation13_spill]] %s1601_s18  ;;  %355 = sbr.rel (%p352_p10) target bundleno = 1208 (0x4b8), region = 52 }
  0x19   : > { %s1433_s21 = scalar_select %p252_p11, %s1293_s29, %s254_s20  }
  0x1a   : > { %s1584_s22 = sand.u32 (!%p352_p10), 1, %s1289_s28   ;;  %p418_p12 = scmp.lt.s32.totalorder (!%p352_p10), %s1301_s9, 1 }
  0x1b   : > { %1603 = sst [smem:[#allocation14_spill]] %s1433_s21  ;;  %s1031_s23 = sshll.u32 (!%p352_p10), %s1584_s22, 4 }
  0x1c   : > { %p435_p13 = scmp.lt.s32.totalorder (!%p352_p10), %s1297_s30, 3  ;;  %s1604_s0 = sld [smem:[#allocation15_spill]] (!%p352_p10) }
  0x1d   : > { %s419_s24 = scalar_select %p418_p12, %s1301_s9, 1 }
  0x1e   : > { %s436_s25 = scalar_select %p435_p13, %s1297_s30, 3 }
  0x1f   : > { %s1066_s26 = sshll.u32 %s419_s24, 3  ;;  %s1034_s13 = sshll.u32 %s419_s24, 2 }
  0x20   : > { %s1605_s1 = sld [smem:[#allocation16_spill]]  ;;  %s1455_s29 = scalar_lea.vmem %s1573_s2, %s1034_s13 }
  0x21   : > { %s1067_s22 = sshll.u32 %s436_s25, 4  ;;  %s1070_s16 = sshll.u32 %s436_s25, 3 }
  0x22   : > { %s1445_s20 = scalar_lea.vmem %s1604_s0, %s1066_s26  ;;  %s439_s24 = scalar_lea.vmem %s1574_s3, %s1067_s22 }
  0x23   : > { %s444_s26 = scalar_lea.vmem %s1575_s4, %s1067_s22  ;;  %s1466_s15 = scalar_lea.vmem %s1576_s5, %s1067_s22 }
  0x24   : > { %s1471_s10 = scalar_lea.vmem %s1577_s6, %s1070_s16  ;;  %s1473_s21 = scalar_lea.vmem [#allocation3], %s1031_s23 }
  0x25   : > { %p1044_p0 = scmp.ne.s32.totalorder %s1297_s30, 0 }
  0x26   : > { %s1450_s11 = scalar_lea.vmem %s1605_s1, %s1034_s13 }
  0x27   : > { %460 = sbr.rel (%p1044_p0) target bundleno = 46 (0x2e), region = 56 }
  0x2c   : > { %vm461_vm0 = vcmask 261120   ;;  %v1315_v0 = vmov 0.0  }
  0x2d   : > { %462 = vst.msk [vmem:[#allocation2] sm:$0xff] %vm461_vm0, %v1315_v0  ;;  %463 = vst.msk [vmem:[#allocation2 + $0x8] sm:$0xff] %vm461_vm0, %v1315_v0 }
  0x2e PF: > { %v1205_v1 = vld [vmem:[%s439_s24 + $0x8] sm:$0xff]   ;;  %v1316_v2 = vmov 0.0   ;;  %v1207_v4 = vld [vmem:[%s439_s24] sm:$0xff]   ;;  %vm1317_vm1 = vmmov 0   ;;  %vm487_vm2 = vcmask 261120   ;;  %vm654_vm3 = vcmask 130048  }
  0x2f   : > { %1087 = vmatprep.subr.bf16.mxu0 %v1316_v2  ;;  %1095 = vmatprep.subr.bf16.mxu1 %v1316_v2  ;;  %v1206_v3 = vld [vmem:[%s444_s26 + $0x8] sm:$0xff]   ;;  %v1208_v5 = vld [vmem:[%s444_s26] sm:$0xff]   ;;  %vm704_vm4 = vcmask 64512   ;;  %vm732_vm5 = vcmask 1043456   ;;  %p1059_p1 = scmp.ne.s32.totalorder %s1297_s30, 3 }
  0x30   : > { %1088 = vmatpush3.bf16.msra.mxu0 %v1205_v1  ;;  %1091 = vmatprep.mubr.msk.bf16.mxu0 %vm1317_vm1, %v1316_v2  ;;  %v1209_v6 = vld [vmem:[%s1445_s20] sm:$0xff]   ;;  %v1210_v19 = vld [vmem:[%s1466_s15 + $0x8] sm:$0xff]  }
  0x31   : > { %1096 = vmatpush3.bf16.msra.mxu1 %v1206_v3  ;;  %1089 = vmatprep.subr.bf16.mxu0 %v1316_v2  ;;  %v532_v7 = vld [vmem:[%s1450_s11] sm:$0xf] }
  0x32   : > { %1097 = vmatprep.subr.bf16.mxu1 %v1316_v2  ;;  %1099 = vmatprep.mubr.msk.bf16.mxu1 %vm1317_vm1, %v1316_v2  ;;  %v1211_v20 = vld [vmem:[%s1466_s15] sm:$0xff]  }
  0x33   : > { %v592_v21 = vld [vmem:[%s1455_s29] sm:$0xf] }
  0x34   : > { %1090 = vmatpush3.bf16.msra.mxu0 %v1207_v4  ;;  %v1212_v53 = vld [vmem:[%s1471_s10] sm:$0xff]   ;;  %v778_v63 = vld [vmem:[#allocation2 + $0x8] sm:$0xff] }
  0x35   : > { %1098 = vmatpush3.bf16.msra.mxu1 %v1208_v5  ;;  %1103 = vmatprep.subr.bf16.mxu0 %v1316_v2  ;;  %v777_v59 = vld [vmem:[#allocation2] sm:$0xff] }
  0x36   : > { %1111 = vmatprep.subr.bf16.mxu1 %v1316_v2 }
  0x37   : > { %1092 = vmatmul.mubr.msk.bf16.vlgmr.msra.gmra.mxu0 %vm487_vm2, %v1209_v6 }
  0x38   : > { %1100 = vmatmul.mubr.msk.bf16.vlgmr.msra.gmra.mxu1 %vm487_vm2, %v532_v7  ;;  %1107 = vmatprep.mubr.msk.bf16.mxu0 %vm1317_vm1, %v1316_v2 }
  0x39   : > { %1113 = vmatprep.mubr.msk.bf16.mxu1 %vm1317_vm1, %v1316_v2  ;;  %1104 = vmatpush3.bf16.msra.mxu0 %v1210_v19 }
  0x3a   : > { %1105 = vmatprep.subr.bf16.mxu0 %v1316_v2 }
  0x3d   : > { %1106 = vmatpush3.bf16.msra.mxu0 %v1211_v20 }
  0x3e   : > { %1117 = vmatprep.subr.bf16.mxu0 %v1316_v2 }
  0x40   : > { %1108 = vmatmul.mubr.msk.bf16.vlgmr.msra.gmra.mxu0 %vm487_vm2, %v592_v21 }
  0x41   : > { %1119 = vmatprep.mubr.msk.bf16.mxu0 %vm1317_vm1, %v1316_v2 }
  0xf7   : > { %v525_v8 = vpop.f32.mrf.mxu0 }
  0xf8   : > { %v586_v9 = vpop.f32.mrf.mxu1 }
  0xf9   : > { %v653_v10 = vpack.c.bf16 %v586_v9, %v586_v9  ;;  %v1093_v11 = vpop.f32.mrf.mxu0 }
  0xfa   : > { %v1101_v12 = vpop.f32.mrf.mxu1 }
  0xfb   : > { %v659_v13 = vsel %vm654_vm3, %v653_v10, 0  ;;  %v528_v14 = vpop.f32.mrf.mxu0 }
  0xfc   : > { %v589_v15 = vpop.f32.mrf.mxu1  ;;  %1112 = vmatpush3.bf16.xpose.msra.mxu1 %v659_v13  ;;  %v652_v18 = vpack.c.bf16 %v528_v14, %v525_v8 }
  0xfd   : > { %v1094_v16 = vpop.f32.mrf.mxu0  ;;  %1123 = vmatprep.subr.bf16.mxu1 %v1316_v2 }
  0xfe   : > { %v1102_v17 = vpop.f32.mrf.mxu1 }
 0x100   : > { %v646_v40 = vpop.f32.mrf.mxu0 }
 0x101   : > { %v728_v44 = vpack.c.bf16 %v646_v40, %v646_v40 }
 0x102   : > { %v1109_v41 = vpop.f32.mrf.mxu0 }
 0x103   : > { %1114 = vmatmul.mubr.msk.bf16.vlgmr.msra.gmra.mxu1 %vm654_vm3, %v652_v18  ;;  %v734_v45 = vsel %vm732_vm5, %v728_v44, 0 }
 0x104   : > { %1125 = vmatprep.mubr.msk.bf16.mxu1 %vm1317_vm1, %v1316_v2  ;;  %v649_v42 = vpop.f32.mrf.mxu0  ;;  %1118 = vmatpush3.bf16.msra.mxu0 %v734_v45 }
 0x105   : > { %1124 = vmatpush3.bf16.msra.mxu1 %v1212_v53 }
 0x106   : > { %v1110_v43 = vpop.f32.mrf.mxu0 }
 0x1c3   : > { %v695_v22 = vpop.f32.mrf.mxu1 }
 0x1c4   : > { %v702_v23 = vmul.f32 0.25, %v695_v22 }
 0x1c5   : > { %v1115_v24 = vpop.f32.mrf.mxu1 }
 0x1c6   : > { %v705_v25 = vsel %vm704_vm4, %v702_v23, -inf }
 0x1c7   : > { %706 = vmax.xlane.f32.xlu0 %v705_v25  ;;  %v698_v26 = vpop.f32.mrf.mxu1 }
 0x1c8   : > { %v703_v27 = vmul.f32 0.25, %v698_v26 }
 0x1c9   : > { %v1116_v28 = vpop.f32.mrf.mxu1 }
 0x1ca   : > { %v708_v29 = vsel %vm704_vm4, %v703_v27, -inf }
 0x1cb   : > { %709 = vmax.xlane.f32.xlu0 %v708_v29 }
 0x250   : > { %v707_v30 = vpop.xlane.xlu0 %706 }
 0x251   : > { %v711_v31 = vsub.f32 %v702_v23, %v707_v30 }
 0x253   : > { %v713_v32 = vmul.f32 1.442695, %v711_v31 }
 0x254   : > { %v710_v33 = vpop.xlane.xlu0 %709 }
 0x255   : > { %1213 = vpow2.f32 %v713_v32  ;;  %v712_v34 = vsub.f32 %v703_v27, %v710_v33 }
 0x257   : > { %v715_v35 = vmul.f32 1.442695, %v712_v34 }
 0x259   : > { %1215 = vpow2.f32 %v715_v35 }
 0x262   : > { %v1214_v36 = vpop.eup %1213 }
 0x263   : > { %v717_v37 = vsel %vm704_vm4, %v1214_v36, 0.0 }
 0x264   : > { %718 = vadd.xlane.f32.xlu1 %v717_v37 }
 0x266   : > { %v1216_v38 = vpop.eup %1215 }
 0x267   : > { %v720_v39 = vsel %vm704_vm4, %v1216_v38, 0.0 }
 0x268   : > { %721 = vadd.xlane.f32.xlu1 %v720_v39 }
 0x2ed   : > { %v719_v46 = vpop.xlane.xlu1 %718 }
 0x2ee   : > { %1217 = vrcp.f32 %v719_v46 }
 0x2f1   : > { %v722_v47 = vpop.xlane.xlu1 %721 }
 0x2f2   : > { %1219 = vrcp.f32 %v722_v47 }
 0x2fb   : > { %v1218_v48 = vpop.eup %1217 }
 0x2fc   : > { %v725_v51 = vmul.f32 %v1218_v48, %v1214_v36 }
 0x2ff   : > { %v1220_v49 = vpop.eup %1219 }
 0x300   : > { %v726_v50 = vmul.f32 %v1220_v49, %v1216_v38 }
 0x302   : > { %v727_v52 = vpack.c.bf16 %v726_v50, %v725_v51 }
 0x304   : > { %1120 = vmatmul.mubr.msk.bf16.vlgmr.msra.gmra.mxu0 %vm704_vm4, %v727_v52 }
 0x3c4   : > { %v770_v54 = vpop.f32.mrf.mxu0 }
 0x3c6   : > { %v1121_v55 = vpop.f32.mrf.mxu0 }
 0x3c8   : > { %v773_v56 = vpop.f32.mrf.mxu0 }
 0x3c9   : > { %v779_v57 = vpack.c.bf16 %v773_v56, %v770_v54 }
 0x3ca   : > { %v1122_v58 = vpop.f32.mrf.mxu0 }
 0x3cb   : > { %1126 = vmatmul.mubr.msk.bf16.vlgmr.msra.gmra.mxu1 %vm654_vm3, %v779_v57 }
 0x48b   : > { %v825_v60 = vpop.f32.mrf.mxu1 }
 0x48c   : > { %v832_v61 = vadd.f32 %v825_v60, %v777_v59 }
 0x48d   : > { %v1127_v62 = vpop.f32.mrf.mxu1 }
 0x48e   : > { %834 = vst.msk [vmem:[#allocation2] sm:$0xff] %vm487_vm2, %v832_v61  ;;  %839 = sbr.rel (%p1059_p1) target bundleno = 1181 (0x49d), region = 60 }
 0x48f   : > { %v828_v0 = vpop.f32.mrf.mxu1 }
 0x490   : > { %v833_v1 = vadd.f32 %v828_v0, %v778_v63 }
 0x491   : > { %v1128_v2 = vpop.f32.mrf.mxu1 }
 0x492   : > { %835 = vst.msk [vmem:[#allocation2 + $0x8] sm:$0xff] %vm487_vm2, %v833_v1 }
 0x493   : > { %v1060_v4 = vld [vmem:[%s1578_s7] ss:$0 sm:$0xff] }
 0x495   : > { %v840_v3 = vld [vmem:[#allocation2] sm:$0xff] }
 0x496   : > { %v849_v6 = vadd.f32 %v1060_v4, %v840_v3 }
 0x498   : > { %851 = vst.msk [vmem:[%s1473_s21] sm:$0xff] %vm487_vm2, %v849_v6 }
 0x499   : > { %v841_v5 = vld [vmem:[#allocation2 + $0x8] sm:$0xff] }
 0x49a   : > { %v850_v7 = vadd.f32 %v1060_v4, %v841_v5 }
 0x49c   : > { %852 = vst.msk [vmem:[%s1473_s21 + $0x8] sm:$0xff] %vm487_vm2, %v850_v7 }
 0x49d PF: > { %s1071_s8 = sshll.u32 %s1301_s9, 8  ;;  %s1606_s30 = sld [smem:[#allocation17_spill]] }
 0x49e   : > { %s869_s12 = sshll.u32 %s1473_s21, 4  ;;  %s1608_s22 = sand.u32 1, %s1289_s28   ;;  %s1516_s12 = int_to_ptr.vmem [resolvable:$true] %s869_s12 }
 0x49f   : > { %s1520_s23 = scalar_lea.sflag [#allocation4], %s1608_s22  ;;  %s1221_s25 = scalar_lea.vmem %s1516_s12, 256 }
 0x4a0   : > { %p1222_p2 = scmp.ne.s32.totalorder %s1516_s12, %s1221_s25  ;;  %s1318_s9 = smov [#allocation3]  }
 0x4a1   : > { %s1225_s13 = sshll.u32 %s1318_s9, 4  ;;  %s1226_s13 = int_to_ptr.vmem [resolvable:$false] %s1225_s13 }
 0x4a2   : > { %p1223_p4 = pnand %p1222_p2, %p1415_p3  ;;  %s1227_s20 = scalar_lea.vmem %s1226_s13, 512 }
 0x4a3   : > { %s1607_s18 = smov %s1606_s30  ;;  %s1513_s11 = scalar_lea.hbm %s1606_s30, %s1071_s8 }
 0x4a4   : > { %p1224_p5 = pneg %p1223_p4  ;;  %p1228_p6 = scmp.lt.s32.totalorder %s1516_s12, %s1226_s13 }
 0x4a5   : > { %p1229_p7 = scmp.lt.s32.totalorder %s1227_s20, %s1221_s25 }
 0x4a7   : > { %p1230_p8 = por %p1229_p7, %p1228_p6 }
 0x4a9   : > { %p1231_p10 = pnand %p1230_p8, %p1224_p5 }
 0x4ab   : > { %1234 = shalt.err (!%p1231_p10)
}
 0x4ac   : > { %s1235_s24 = scalar_lea.hbm %s1513_s11, 256  ;;  %s1239_s19 = scalar_lea.hbm %s1607_s18, 512 }
 0x4ad   : > { %p1236_p11 = scmp.ne.s32.totalorder %s1513_s11, %s1235_s24  ;;  %p1240_p0 = scmp.lt.s32.totalorder %s1513_s11, %s1607_s18 }
 0x4ae   : > { %p1241_p1 = scmp.lt.s32.totalorder %s1239_s19, %s1235_s24 }
 0x4af   : > { %p1237_p12 = pnand %p1236_p11, %p1415_p3 }
 0x4b0   : > { %p1242_p2 = por %p1241_p1, %p1240_p0 }
 0x4b1   : > { %p1238_p13 = pneg %p1237_p12 }
 0x4b3   : > { %p1243_p4 = pnand %p1242_p2, %p1238_p13 }
 0x4b5   : > { %1246 = shalt.err (!%p1243_p4)
}
 0x4b6   : > { %s1319_s10 = smov 128   ;;  %s1320_s21 = smov 8  }
 0x4b7   : > { %1129 = dma.vmem_to_hbm [thread:$0]  (%p1415_p3), %s1516_s12, 256, %s1513_s11, %s1520_s23, %s1319_s10, %s1319_s10, %s1320_s21  }
 0x4b8 PF: > { %s1609_s0 = sld [smem:[#allocation10_spill]] }
 0x4b9   : > { %s1610_s1 = sld [smem:[#allocation6_spill]] }
 0x4be   : > { %p1135_p5 = scmp.ge.s32.totalorder %s1609_s0, 2 }
 0x4bf   : > { %s884_s27 = sand.u32 1, %s1610_s1  }
 0x4c0   : > { %p1132_p6 = pnand %p1135_p5, %p1425_p9  ;;  %s885_s29 = scalar_lea.sflag [#allocation4], %s884_s27 }
 0x4c2   : > { %p1133_p7 = pneg %p1132_p6 }
 0x4c4   : > { %1280 = dma.done.wait (%p1133_p7), %s885_s29, 256  }
 0x4c5   : > { %1282 = vsyncadd (%p1133_p7), %s885_s29, 4294967040  ;;  %s21_s12 = sadd.s32 1, %s1609_s0   ;;  %s1612_s30 = sld [smem:[#allocation7_spill]] }
 0x4c6   : > { %p18_p8 = scmp.ge.s32.totalorder %s21_s12, 10   ;;  %s1613_s29 = sld [smem:[#allocation14_spill]] }
 0x4c7   : > { %s1614_s17 = sld [smem:[#allocation8_spill]]  ;;  %s1618_s27 = smov %s1289_s28 }
 0x4c8   : > { %s1615_s9 = sld [smem:[#allocation9_spill]] }
 0x4c9   : > { %s1616_s10 = sld [smem:[#allocation11_spill]]  ;;  %20 = sbr.rel (!%p18_p8) target bundleno = 9 (0x9), region = 113 }
 0x4ca   : > { %s1617_s11 = sld [smem:[#allocation12_spill]] }
 0x4cb   : > { %s1619_s28 = smov %s1612_s30 }
 0x4cd   : > { %s1620_s30 = smov %s1614_s17 }
 0x4ce   :  { %890 = vsyncpa [#allocation4], 1 }
 0x4cf   :  { %892 = vsyncpa [#allocation4 + $0x1], 1 }

</bundles_post_ra>
